<compile_context>
chip_gen: v7x
topology: tpu7x:2x2x1
jax: 0.10.0
libtpu: 0.0.40
codegen_flags: <defaults>
</compile_context>

<pallas_src>
import numpy as np

import jax
import jax.numpy as jnp
from jax import lax
from jax.experimental import pallas as pl
from jax.experimental.pallas import tpu as pltpu


def _resblock_kernel(x_ref, w1_ref, s1_ref, t1_ref, w2_ref, s2_ref, t2_ref,
                     out_ref, pad_ref):
    """One batch element per grid step, lane-dense (G, g*W*C) packed layout.

    x_ref  : (1, G, P) f32  input image, g rows packed per sublane row (P=g*W*C)
    w*_ref : (3, P, P) f32  banded conv weights, one slab per super-row offset
    s*/t*  : (1, P)    f32  folded BN scale / shift (conv bias included)
    out_ref: (1, G, P) f32
    pad_ref: (G+2, P)  f32  scratch: 1-super-row top/bottom halo buffer
    """
    _, G, P = x_ref.shape

    x0 = x_ref[0]                                      # (G, P)

    # Zero only the two halo rows; the interior is fully overwritten below.
    zrow = jnp.zeros((1, P), jnp.float32)
    pad_ref[0:1, :] = zrow
    pad_ref[G + 1:G + 2, :] = zrow

    def conv_bn(w_ref, s_ref, t_ref):
        # 3x3 conv = 3 dense MXU matmuls; the kh/kw taps, the row packing and
        # the W-dim zero padding live inside the banded weight slabs, so the
        # only data movement here is a 0/1/2-row sublane offset on the halo
        # buffer.
        acc = jnp.dot(pad_ref[0:G, :], w_ref[0],
                      preferred_element_type=jnp.float32)
        acc = acc + jnp.dot(pad_ref[1:G + 1, :], w_ref[1],
                            preferred_element_type=jnp.float32)
        acc = acc + jnp.dot(pad_ref[2:G + 2, :], w_ref[2],
                            preferred_element_type=jnp.float32)
        return acc * s_ref[...] + t_ref[...]

    # conv1 + BN1 + ReLU
    pad_ref[1:G + 1, :] = x0
    y1 = jnp.maximum(conv_bn(w1_ref, s1_ref, t1_ref), 0.0)

    # conv2 + BN2 (reuse the same halo scratch; border rows are still zero)
    pad_ref[1:G + 1, :] = y1
    y2 = conv_bn(w2_ref, s2_ref, t2_ref)

    # residual add + ReLU, full-vreg lane-dense store
    out_ref[0] = jnp.maximum(y2 + x0, 0.0)


def _pick_row_group(H, WC, max_lanes=1024):
    """Smallest g with H % g == 0 and (g*W*C) a multiple of 128 (lane-dense)."""
    for g in range(1, H + 1):
        lanes = g * WC
        if lanes > max_lanes:
            break
        if H % g == 0 and lanes % 128 == 0:
            return g
    return 1


def _banded_weights(w_oihw, W, g):
    """PyTorch conv weight (Cout, Cin, 3, 3) -> (3, g*W*Cin, g*W*Cout) slabs.

    For an output element at (super-row r, in-group row rh, col w, chan co),
    the kh tap reads image row r*g + rh + kh - 1, which lives in super-row
    r + d (d = (rh+kh-1)//g) at in-group row ir = (rh+kh-1) - d*g.  The kw
    taps and the W-dim zero padding are folded into the band as well.  The
    connectivity pattern is static, so it is built once in numpy and combined
    with the (traced) weights via a single einsum.
    """
    Cout, Cin, KH, KW = w_oihw.shape
    w_hwio = jnp.transpose(w_oihw, (2, 3, 1, 0)).astype(jnp.float32)  # (3,3,Ci,Co)
    gW = g * W

    A = np.zeros((3, gW, gW, KH, KW), np.float32)      # (d+1, in_pos, out_pos, kh, kw)
    for kh in range(KH):
        for rh in range(g):
            q = rh + kh - 1
            d = q // g                                  # super-row offset in {-1,0,1}
            ir = q - d * g                              # row within that super-row
            for kw in range(KW):
                for w in range(W):
                    win = w + kw - 1
                    if 0 <= win < W:                    # taps into W-padding dropped
                        A[d + 1, ir * W + win, rh * W + w, kh, kw] = 1.0

    slabs = jnp.einsum("dioyx,yxcf->dicof", jnp.asarray(A), w_hwio)
    return slabs.reshape(3, gW * Cin, gW * Cout)


def _folded_bn(b, gamma, beta, mean, var, reps, eps=1e-5):
    """Inference-mode BN (+ conv bias) folded into per-lane scale/shift."""
    scale = gamma / jnp.sqrt(var + eps)
    shift = beta - scale * mean + scale * b
    return (jnp.tile(scale, reps).reshape(1, -1).astype(jnp.float32),
            jnp.tile(shift, reps).reshape(1, -1).astype(jnp.float32))


def resblock_pallas(x_nchw, params):
    """params: dict with w1,b1,g1,beta1,mean1,var1,w2,b2,g2,beta2,mean2,var2."""
    N, C, H, W = x_nchw.shape
    WC = W * C
    g = _pick_row_group(H, WC)          # rows packed per sublane row
    G = H // g                          # sublane rows per image
    P = g * WC                          # lanes per sublane row (128-multiple here)

    # NCHW -> NHWC -> (N, G, g*W*C): (row-in-group, col, chan) vary fastest.
    x = jnp.transpose(x_nchw, (0, 2, 3, 1)).astype(jnp.float32).reshape(N, G, P)

    w1 = _banded_weights(params["w1"], W, g)
    w2 = _banded_weights(params["w2"], W, g)
    s1, t1 = _folded_bn(params["b1"], params["g1"], params["beta1"],
                        params["mean1"], params["var1"], g * W)
    s2, t2 = _folded_bn(params["b2"], params["g2"], params["beta2"],
                        params["mean2"], params["var2"], g * W)

    img_spec = pl.BlockSpec((1, G, P), lambda n: (n, 0, 0))       # pipelined
    w_spec = pl.BlockSpec((3, P, P), lambda n: (0, 0, 0))         # resident
    v_spec = pl.BlockSpec((1, P), lambda n: (0, 0))               # resident

    out = pl.pallas_call(
        _resblock_kernel,
        out_shape=jax.ShapeDtypeStruct((N, G, P), jnp.float32),
        grid_spec=pltpu.PrefetchScalarGridSpec(
            num_scalar_prefetch=0,
            grid=(N,),
            in_specs=[img_spec, w_spec, v_spec, v_spec, w_spec, v_spec, v_spec],
            out_specs=img_spec,
            scratch_shapes=[pltpu.VMEM((G + 2, P), jnp.float32)],
        ),
        compiler_params=pltpu.CompilerParams(
            dimension_semantics=("parallel",),
            vmem_limit_bytes=32 * 1024 * 1024,
        ),
    )(x, w1, s1, t1, w2, s2, t2)

    return jnp.transpose(out.reshape(N, H, W, C), (0, 3, 1, 2))    # -> NCHW


def resblock_reference(x_nchw, params):
    """Pure-JAX reference (eval-mode BN), NCHW in/out."""
    eps = 1e-5
    x = jnp.transpose(x_nchw, (0, 2, 3, 1)).astype(jnp.float32)

    def conv_bn(y, w_oihw, b, gamma, beta, mean, var):
        w = jnp.transpose(w_oihw, (2, 3, 1, 0)).astype(jnp.float32)  # HWIO
        z = lax.conv_general_dilated(
            y, w, window_strides=(1, 1), padding="SAME",
            dimension_numbers=("NHWC", "HWIO", "NHWC")) + b
        return gamma * (z - mean) / jnp.sqrt(var + eps) + beta

    y = conv_bn(x, params["w1"], params["b1"], params["g1"],
                params["beta1"], params["mean1"], params["var1"])
    y = jnp.maximum(y, 0.0)
    y = conv_bn(y, params["w2"], params["b2"], params["g2"],
                params["beta2"], params["mean2"], params["var2"])
    out = jnp.maximum(y + x, 0.0)
    return jnp.transpose(out, (0, 3, 1, 2))


def make_params(key, num_filters):
    C = num_filters
    ks = jax.random.split(key, 12)
    p = {}
    for i, tag in enumerate(("1", "2")):
        base = i * 6
        p["w" + tag] = 0.1 * jax.random.normal(ks[base + 0], (C, C, 3, 3), jnp.float32)
        p["b" + tag] = 0.1 * jax.random.normal(ks[base + 1], (C,), jnp.float32)
        p["g" + tag] = 1.0 + 0.1 * jax.random.normal(ks[base + 2], (C,), jnp.float32)
        p["beta" + tag] = 0.1 * jax.random.normal(ks[base + 3], (C,), jnp.float32)
        p["mean" + tag] = 0.1 * jax.random.normal(ks[base + 4], (C,), jnp.float32)
        p["var" + tag] = jax.nn.softplus(jax.random.normal(ks[base + 5], (C,), jnp.float32)) + 0.5
    return p


if __name__ == "__main__":
    key = jax.random.PRNGKey(0)
    k_x, k_p = jax.random.split(key)

    num_filters = 4
    x = jax.random.normal(k_x, (2, num_filters, 16, 16), jnp.float32)  # NCHW
    params = make_params(k_p, num_filters)

    out = jax.jit(resblock_pallas)(x, params)
    out = jax.block_until_ready(out)

    ref = resblock_reference(x, params)
    assert out.shape == ref.shape
    assert jnp.allclose(out, ref, atol=1e-4, rtol=1e-4), (
        float(jnp.max(jnp.abs(out - ref))))

    print("KERNEL_OK")
</pallas_src>

<mosaic_0001>
module attributes {stable_mosaic.version = 11 : i64} {
  func.func @_resblock_kernel(%arg0: i32, %arg1: memref<1x8x128xf32, #tpu.memory_space<vmem>>, %arg2: memref<3x128x128xf32, #tpu.memory_space<vmem>>, %arg3: memref<1x128xf32, #tpu.memory_space<vmem>>, %arg4: memref<1x128xf32, #tpu.memory_space<vmem>>, %arg5: memref<3x128x128xf32, #tpu.memory_space<vmem>>, %arg6: memref<1x128xf32, #tpu.memory_space<vmem>>, %arg7: memref<1x128xf32, #tpu.memory_space<vmem>>, %arg8: memref<1x8x128xf32, #tpu.memory_space<vmem>>, %arg9: memref<10x128xf32, #tpu.memory_space<vmem>>) attributes {dimension_semantics = [#tpu.dimension_semantics<parallel>], iteration_bounds = array<i64: 2>, scalar_prefetch = 0 : i64, scratch_operands = 1 : i64, tpu.core_type = #tpu.core_type<tc>, window_params = [{transform_indices = @transform_0, window_bounds = array<i64: 1, 8, 128>}, {pipeline_mode = #tpu.pipeline_mode<synchronous>, transform_indices = @transform_1, window_bounds = array<i64: 3, 128, 128>}, {pipeline_mode = #tpu.pipeline_mode<synchronous>, transform_indices = @transform_2, window_bounds = array<i64: 1, 128>}, {pipeline_mode = #tpu.pipeline_mode<synchronous>, transform_indices = @transform_3, window_bounds = array<i64: 1, 128>}, {pipeline_mode = #tpu.pipeline_mode<synchronous>, transform_indices = @transform_4, window_bounds = array<i64: 3, 128, 128>}, {pipeline_mode = #tpu.pipeline_mode<synchronous>, transform_indices = @transform_5, window_bounds = array<i64: 1, 128>}, {pipeline_mode = #tpu.pipeline_mode<synchronous>, transform_indices = @transform_6, window_bounds = array<i64: 1, 128>}, {transform_indices = @transform_7, window_bounds = array<i64: 1, 8, 128>}]} {
    %c0 = arith.constant 0 : index
    %c0_0 = arith.constant 0 : index
    %c0_1 = arith.constant 0 : index
    %0 = vector.load %arg1[%c0, %c0_0, %c0_1] : memref<1x8x128xf32, #tpu.memory_space<vmem>>, vector<1x8x128xf32>
    %1 = vector.shape_cast %0 : vector<1x8x128xf32> to vector<8x128xf32>
    %cst = arith.constant 0.000000e+00 : f32
    %2 = vector.broadcast %cst : f32 to vector<1x128xf32>
    %c0_2 = arith.constant 0 : index
    %c0_3 = arith.constant 0 : index
    %3 = vector.load %arg9[%c0_2, %c0_3] : memref<10x128xf32, #tpu.memory_space<vmem>>, vector<1x128xf32>
    tpu.vector_store %arg9[%c0_2, %c0_3], %2 {strides = array<i32>} : memref<10x128xf32, #tpu.memory_space<vmem>>, vector<1x128xf32>,
    %c9 = arith.constant 9 : index
    %c0_4 = arith.constant 0 : index
    %4 = vector.load %arg9[%c9, %c0_4] : memref<10x128xf32, #tpu.memory_space<vmem>>, vector<1x128xf32>
    tpu.vector_store %arg9[%c9, %c0_4], %2 {strides = array<i32>} : memref<10x128xf32, #tpu.memory_space<vmem>>, vector<1x128xf32>,
    %c1 = arith.constant 1 : index
    %c0_5 = arith.constant 0 : index
    %5 = vector.load %arg9[%c1, %c0_5] : memref<10x128xf32, #tpu.memory_space<vmem>>, vector<8x128xf32>
    tpu.vector_store %arg9[%c1, %c0_5], %1 {strides = array<i32>} : memref<10x128xf32, #tpu.memory_space<vmem>>, vector<8x128xf32>,
    %c0_6 = arith.constant 0 : index
    %c0_7 = arith.constant 0 : index
    %6 = vector.load %arg9[%c0_6, %c0_7] : memref<10x128xf32, #tpu.memory_space<vmem>>, vector<8x128xf32>
    %c0_8 = arith.constant 0 : index
    %c0_9 = arith.constant 0 : index
    %c0_10 = arith.constant 0 : index
    %7 = vector.load %arg2[%c0_8, %c0_9, %c0_10] : memref<3x128x128xf32, #tpu.memory_space<vmem>>, vector<1x128x128xf32>
    %8 = vector.shape_cast %7 : vector<1x128x128xf32> to vector<128x128xf32>
    %cst_11 = arith.constant dense<0.000000e+00> : vector<8x128xf32>
    %9 = tpu.matmul %6, %8, %cst_11 {dimension_numbers = #tpu.dot_dimension_numbers<[1], [0], [0], [1], [0, 0, 1, 1], [], []>} : vector<8x128xf32>, vector<128x128xf32>, vector<8x128xf32> -> vector<8x128xf32>
    %c1_12 = arith.constant 1 : index
    %c0_13 = arith.constant 0 : index
    %10 = vector.load %arg9[%c1_12, %c0_13] : memref<10x128xf32, #tpu.memory_space<vmem>>, vector<8x128xf32>
    %c1_14 = arith.constant 1 : index
    %c0_15 = arith.constant 0 : index
    %c0_16 = arith.constant 0 : index
    %11 = vector.load %arg2[%c1_14, %c0_15, %c0_16] : memref<3x128x128xf32, #tpu.memory_space<vmem>>, vector<1x128x128xf32>
    %12 = vector.shape_cast %11 : vector<1x128x128xf32> to vector<128x128xf32>
    %cst_17 = arith.constant dense<0.000000e+00> : vector<8x128xf32>
    %13 = tpu.matmul %10, %12, %cst_17 {dimension_numbers = #tpu.dot_dimension_numbers<[1], [0], [0], [1], [0, 0, 1, 1], [], []>} : vector<8x128xf32>, vector<128x128xf32>, vector<8x128xf32> -> vector<8x128xf32>
    %14 = arith.addf %9, %13 : vector<8x128xf32>
    %c2 = arith.constant 2 : index
    %c0_18 = arith.constant 0 : index
    %15 = vector.load %arg9[%c2, %c0_18] : memref<10x128xf32, #tpu.memory_space<vmem>>, vector<8x128xf32>
    %c2_19 = arith.constant 2 : index
    %c0_20 = arith.constant 0 : index
    %c0_21 = arith.constant 0 : index
    %16 = vector.load %arg2[%c2_19, %c0_20, %c0_21] : memref<3x128x128xf32, #tpu.memory_space<vmem>>, vector<1x128x128xf32>
    %17 = vector.shape_cast %16 : vector<1x128x128xf32> to vector<128x128xf32>
    %cst_22 = arith.constant dense<0.000000e+00> : vector<8x128xf32>
    %18 = tpu.matmul %15, %17, %cst_22 {dimension_numbers = #tpu.dot_dimension_numbers<[1], [0], [0], [1], [0, 0, 1, 1], [], []>} : vector<8x128xf32>, vector<128x128xf32>, vector<8x128xf32> -> vector<8x128xf32>
    %19 = arith.addf %14, %18 : vector<8x128xf32>
    %c0_23 = arith.constant 0 : index
    %c0_24 = arith.constant 0 : index
    %20 = vector.load %arg3[%c0_23, %c0_24] : memref<1x128xf32, #tpu.memory_space<vmem>>, vector<1x128xf32>
    %21 = vector.broadcast %20 : vector<1x128xf32> to vector<8x128xf32>
    %22 = arith.mulf %19, %21 : vector<8x128xf32>
    %c0_25 = arith.constant 0 : index
    %c0_26 = arith.constant 0 : index
    %23 = vector.load %arg4[%c0_25, %c0_26] : memref<1x128xf32, #tpu.memory_space<vmem>>, vector<1x128xf32>
    %24 = vector.broadcast %23 : vector<1x128xf32> to vector<8x128xf32>
    %25 = arith.addf %22, %24 : vector<8x128xf32>
    %cst_27 = arith.constant 0.000000e+00 : f32
    %26 = vector.broadcast %cst_27 : f32 to vector<8x128xf32>
    %27 = arith.maximumf %25, %26 : vector<8x128xf32>
    %c1_28 = arith.constant 1 : index
    %c0_29 = arith.constant 0 : index
    %28 = vector.load %arg9[%c1_28, %c0_29] : memref<10x128xf32, #tpu.memory_space<vmem>>, vector<8x128xf32>
    tpu.vector_store %arg9[%c1_28, %c0_29], %27 {strides = array<i32>} : memref<10x128xf32, #tpu.memory_space<vmem>>, vector<8x128xf32>,
    %c0_30 = arith.constant 0 : index
    %c0_31 = arith.constant 0 : index
    %29 = vector.load %arg9[%c0_30, %c0_31] : memref<10x128xf32, #tpu.memory_space<vmem>>, vector<8x128xf32>
    %c0_32 = arith.constant 0 : index
    %c0_33 = arith.constant 0 : index
    %c0_34 = arith.constant 0 : index
    %30 = vector.load %arg5[%c0_32, %c0_33, %c0_34] : memref<3x128x128xf32, #tpu.memory_space<vmem>>, vector<1x128x128xf32>
    %31 = vector.shape_cast %30 : vector<1x128x128xf32> to vector<128x128xf32>
    %cst_35 = arith.constant dense<0.000000e+00> : vector<8x128xf32>
    %32 = tpu.matmul %29, %31, %cst_35 {dimension_numbers = #tpu.dot_dimension_numbers<[1], [0], [0], [1], [0, 0, 1, 1], [], []>} : vector<8x128xf32>, vector<128x128xf32>, vector<8x128xf32> -> vector<8x128xf32>
    %c1_36 = arith.constant 1 : index
    %c0_37 = arith.constant 0 : index
    %33 = vector.load %arg9[%c1_36, %c0_37] : memref<10x128xf32, #tpu.memory_space<vmem>>, vector<8x128xf32>
    %c1_38 = arith.constant 1 : index
    %c0_39 = arith.constant 0 : index
    %c0_40 = arith.constant 0 : index
    %34 = vector.load %arg5[%c1_38, %c0_39, %c0_40] : memref<3x128x128xf32, #tpu.memory_space<vmem>>, vector<1x128x128xf32>
    %35 = vector.shape_cast %34 : vector<1x128x128xf32> to vector<128x128xf32>
    %cst_41 = arith.constant dense<0.000000e+00> : vector<8x128xf32>
    %36 = tpu.matmul %33, %35, %cst_41 {dimension_numbers = #tpu.dot_dimension_numbers<[1], [0], [0], [1], [0, 0, 1, 1], [], []>} : vector<8x128xf32>, vector<128x128xf32>, vector<8x128xf32> -> vector<8x128xf32>
    %37 = arith.addf %32, %36 : vector<8x128xf32>
    %c2_42 = arith.constant 2 : index
    %c0_43 = arith.constant 0 : index
    %38 = vector.load %arg9[%c2_42, %c0_43] : memref<10x128xf32, #tpu.memory_space<vmem>>, vector<8x128xf32>
    %c2_44 = arith.constant 2 : index
    %c0_45 = arith.constant 0 : index
    %c0_46 = arith.constant 0 : index
    %39 = vector.load %arg5[%c2_44, %c0_45, %c0_46] : memref<3x128x128xf32, #tpu.memory_space<vmem>>, vector<1x128x128xf32>
    %40 = vector.shape_cast %39 : vector<1x128x128xf32> to vector<128x128xf32>
    %cst_47 = arith.constant dense<0.000000e+00> : vector<8x128xf32>
    %41 = tpu.matmul %38, %40, %cst_47 {dimension_numbers = #tpu.dot_dimension_numbers<[1], [0], [0], [1], [0, 0, 1, 1], [], []>} : vector<8x128xf32>, vector<128x128xf32>, vector<8x128xf32> -> vector<8x128xf32>
    %42 = arith.addf %37, %41 : vector<8x128xf32>
    %c0_48 = arith.constant 0 : index
    %c0_49 = arith.constant 0 : index
    %43 = vector.load %arg6[%c0_48, %c0_49] : memref<1x128xf32, #tpu.memory_space<vmem>>, vector<1x128xf32>
    %44 = vector.broadcast %43 : vector<1x128xf32> to vector<8x128xf32>
    %45 = arith.mulf %42, %44 : vector<8x128xf32>
    %c0_50 = arith.constant 0 : index
    %c0_51 = arith.constant 0 : index
    %46 = vector.load %arg7[%c0_50, %c0_51] : memref<1x128xf32, #tpu.memory_space<vmem>>, vector<1x128xf32>
    %47 = vector.broadcast %46 : vector<1x128xf32> to vector<8x128xf32>
    %48 = arith.addf %45, %47 : vector<8x128xf32>
    %49 = arith.addf %48, %1 : vector<8x128xf32>
    %cst_52 = arith.constant 0.000000e+00 : f32
    %50 = vector.broadcast %cst_52 : f32 to vector<8x128xf32>
    %51 = arith.maximumf %49, %50 : vector<8x128xf32>
    %c0_53 = arith.constant 0 : index
    %c0_54 = arith.constant 0 : index
    %c0_55 = arith.constant 0 : index
    %52 = vector.load %arg8[%c0_53, %c0_54, %c0_55] : memref<1x8x128xf32, #tpu.memory_space<vmem>>, vector<1x8x128xf32>
    %53 = vector.shape_cast %52 : vector<1x8x128xf32> to vector<8x128xf32>
    %54 = vector.shape_cast %51 : vector<8x128xf32> to vector<1x8x128xf32>
    tpu.vector_store %arg8[%c0_53, %c0_54, %c0_55], %54 {strides = array<i32>} : memref<1x8x128xf32, #tpu.memory_space<vmem>>, vector<1x8x128xf32>,
    return
  }
  func.func @transform_0(%arg0: i32) -> (i32, i32, i32) {
    %c0_i32 = arith.constant 0 : i32
    %c0_i32_0 = arith.constant 0 : i32
    %c0_i32_1 = arith.constant 0 : i32
    return %arg0, %c0_i32, %c0_i32_0 : i32, i32, i32
  }
  func.func @transform_1(%arg0: i32) -> (i32, i32, i32) {
    %c0_i32 = arith.constant 0 : i32
    %c0_i32_0 = arith.constant 0 : i32
    %c0_i32_1 = arith.constant 0 : i32
    %c0_i32_2 = arith.constant 0 : i32
    return %c0_i32, %c0_i32_0, %c0_i32_1 : i32, i32, i32
  }
  func.func @transform_2(%arg0: i32) -> (i32, i32) {
    %c0_i32 = arith.constant 0 : i32
    %c0_i32_0 = arith.constant 0 : i32
    %c0_i32_1 = arith.constant 0 : i32
    return %c0_i32, %c0_i32_0 : i32, i32
  }
  func.func @transform_3(%arg0: i32) -> (i32, i32) {
    %c0_i32 = arith.constant 0 : i32
    %c0_i32_0 = arith.constant 0 : i32
    %c0_i32_1 = arith.constant 0 : i32
    return %c0_i32, %c0_i32_0 : i32, i32
  }
  func.func @transform_4(%arg0: i32) -> (i32, i32, i32) {
    %c0_i32 = arith.constant 0 : i32
    %c0_i32_0 = arith.constant 0 : i32
    %c0_i32_1 = arith.constant 0 : i32
    %c0_i32_2 = arith.constant 0 : i32
    return %c0_i32, %c0_i32_0, %c0_i32_1 : i32, i32, i32
  }
  func.func @transform_5(%arg0: i32) -> (i32, i32) {
    %c0_i32 = arith.constant 0 : i32
    %c0_i32_0 = arith.constant 0 : i32
    %c0_i32_1 = arith.constant 0 : i32
    return %c0_i32, %c0_i32_0 : i32, i32
  }
  func.func @transform_6(%arg0: i32) -> (i32, i32) {
    %c0_i32 = arith.constant 0 : i32
    %c0_i32_0 = arith.constant 0 : i32
    %c0_i32_1 = arith.constant 0 : i32
    return %c0_i32, %c0_i32_0 : i32, i32
  }
  func.func @transform_7(%arg0: i32) -> (i32, i32, i32) {
    %c0_i32 = arith.constant 0 : i32
    %c0_i32_0 = arith.constant 0 : i32
    %c0_i32_1 = arith.constant 0 : i32
    return %arg0, %c0_i32, %c0_i32_0 : i32, i32, i32
  }
}

</mosaic_0001>

<bundles_post_ra>
// kernel: tile.23
= control target key start
LH: loop header
LB: loop body
LE: loop exit
PB: predicated region body
PF: predicated region fallthrough
CT: control target
= control target key end

     0   :  { %s40_s0 = inlined_call_operand.vmem [shape: f32[4], index: 0, kind: input, shape index: {}]   ;;  %s41_s1 = inlined_call_operand.vmem [shape: f32[32,4], index: 1, kind: output, shape index: {}]  }
   0x1   :  { %v4_v0 = vld [vmem:[%s40_s0] ss:$0 sm:$0xff] }
   0x2   :  { %5 = vst [vmem:[%s41_s1] sm:$0xff] %v4_v0  ;;  %12 = vst [vmem:[%s41_s1 + $0x8] sm:$0xff] %v4_v0 }
   0x3   :  { %13 = vst [vmem:[%s41_s1 + $0x10] sm:$0xff] %v4_v0  ;;  %14 = vst [vmem:[%s41_s1 + $0x18] sm:$0xff] %v4_v0 }

// kernel: tile.24
= control target key start
LH: loop header
LB: loop body
LE: loop exit
PB: predicated region body
PF: predicated region fallthrough
CT: control target
= control target key end

     0   :  { %s259_s10 = smov 124   ;;  %s260_s11 = smov 116   ;;  %vm3_vm0 = vcmask 31744   ;;  %vm9_vm1 = vcmask 1048544   ;;  %vm15_vm2 = vcmask 1015744   ;;  %vm21_vm3 = vcmask 982944   ;;  %s399_s0 = inlined_call_operand.vmem [shape: f32[32,4], index: 0, kind: input, shape index: {}]   ;;  %s400_s1 = inlined_call_operand.vmem [shape: f32[1,128], index: 1, kind: output, shape index: {}]  }
   0x1   :  { %v197_v0 = vld [vmem:[%s399_s0 + $0x1f] sm:$0x1]   ;;  %v199_v1 = vld [vmem:[%s399_s0 + $0x1d] sm:$0x1]   ;;  %v198_v2 = vld [vmem:[%s399_s0 + $0x1e] sm:$0x1]  }
   0x2   :  { %7 = vrot.lane.b32.xlu0 %v197_v0, %s259_s10  ;;  %19 = vrot.lane.b32.xlu1 %v199_v1, %s260_s11  ;;  %v200_v3 = vld [vmem:[%s399_s0 + $0x1c] sm:$0x1]   ;;  %s261_s16 = smov 120   ;;  %s262_s17 = smov 112   ;;  %v201_v4 = vld [vmem:[%s399_s0 + $0x1b] sm:$0x1]  }
   0x3   :  { %v202_v5 = vld [vmem:[%s399_s0 + $0x1a] sm:$0x1]   ;;  %s263_s22 = smov 108   ;;  %s264_s23 = smov 104   ;;  %v203_v6 = vld [vmem:[%s399_s0 + $0x19] sm:$0x1]  }
   0x4   :  { %v204_v7 = vld [vmem:[%s399_s0 + $0x18] sm:$0x1]   ;;  %s265_s28 = smov 100   ;;  %s266_s29 = smov 96   ;;  %v205_v8 = vld [vmem:[%s399_s0 + $0x17] sm:$0x1]  }
   0x5   :  { %v206_v9 = vld [vmem:[%s399_s0 + $0x16] sm:$0x1]   ;;  %v2_v10 = vld [vmem:[%s399_s0] sm:$0x1]   ;;  %s267_s7 = smov 92   ;;  %s268_s8 = smov 88  }
   0x6   :  { %13 = vrot.lane.b32.xlu0 %v198_v2, %s261_s16  ;;  %25 = vrot.lane.b32.xlu1 %v200_v3, %s262_s17  ;;  %4 = vst.msk [vmem:[#allocation0] sm:$0x1] %vm3_vm0, %v2_v10   ;;  %v207_v11 = vld [vmem:[%s399_s0 + $0x15] sm:$0x1]   ;;  %v208_v12 = vld [vmem:[%s399_s0 + $0x14] sm:$0x1]  }
   0x7   :  { %s269_s13 = smov 84   ;;  %s270_s14 = smov 80   ;;  %v209_v13 = vld [vmem:[%s399_s0 + $0x13] sm:$0x1]   ;;  %v210_v14 = vld [vmem:[%s399_s0 + $0x12] sm:$0x1]  }
   0x8   :  { %s271_s19 = smov 76   ;;  %s272_s20 = smov 72   ;;  %v211_v15 = vld [vmem:[%s399_s0 + $0x11] sm:$0x1]   ;;  %v212_v16 = vld [vmem:[%s399_s0 + $0x10] sm:$0x1]  }
   0x9   :  { %s273_s25 = smov 68   ;;  %s274_s26 = smov 64   ;;  %v213_v17 = vld [vmem:[%s399_s0 + $0xf] sm:$0x1]   ;;  %v214_v18 = vld [vmem:[%s399_s0 + $0xe] sm:$0x1]  }
   0xa   :  { %31 = vrot.lane.b32.xlu0 %v201_v4, %s263_s22  ;;  %37 = vrot.lane.b32.xlu1 %v202_v5, %s264_s23  ;;  %s275_s2 = smov 60   ;;  %s276_s3 = smov 56   ;;  %v215_v19 = vld [vmem:[%s399_s0 + $0xd] sm:$0x1]   ;;  %v216_v20 = vld [vmem:[%s399_s0 + $0xc] sm:$0x1]  }
   0xb   :  { %s278_s9 = smov 48   ;;  %v217_v21 = vld [vmem:[%s399_s0 + $0xb] sm:$0x1]   ;;  %v218_v22 = vld [vmem:[%s399_s0 + $0xa] sm:$0x1]   ;;  %s280_s15 = smov 40  }
   0xc   :  { %v219_v23 = vld [vmem:[%s399_s0 + $0x9] sm:$0x1]   ;;  %v220_v24 = vld [vmem:[%s399_s0 + $0x8] sm:$0x1]   ;;  %s282_s21 = smov 32   ;;  %s284_s27 = smov 24  }
   0xd   :  { %v221_v25 = vld [vmem:[%s399_s0 + $0x7] sm:$0x1]   ;;  %v222_v26 = vld [vmem:[%s399_s0 + $0x6] sm:$0x1]   ;;  %v223_v27 = vld [vmem:[%s399_s0 + $0x5] sm:$0x1]  }
   0xe   :  { %43 = vrot.lane.b32.xlu0 %v203_v6, %s265_s28  ;;  %49 = vrot.lane.b32.xlu1 %v204_v7, %s266_s29  ;;  %v224_v28 = vld [vmem:[%s399_s0 + $0x4] sm:$0x1]   ;;  %s286_s4 = smov 16   ;;  %v225_v29 = vld [vmem:[%s399_s0 + $0x3] sm:$0x1]   ;;  %s288_s10 = smov 8  }
   0xf   :  { %v226_v30 = vld [vmem:[%s399_s0 + $0x2] sm:$0x1]   ;;  %v227_v31 = vld [vmem:[%s399_s0 + $0x1] sm:$0x1]   ;;  %s289_s0 = smov 4   ;;  %vm27_vm4 = vcmask 950144  }
  0x10   :  { %vm33_vm5 = vcmask 917344   ;;  %vm39_vm6 = vcmask 884544   ;;  %vm45_vm7 = vcmask 851744   ;;  %vm51_vm8 = vcmask 818944  }
  0x11   :  { %vm57_vm9 = vcmask 786144   ;;  %vm63_vm10 = vcmask 753344   ;;  %vm69_vm11 = vcmask 720544   ;;  %vm75_vm12 = vcmask 687744  }
  0x12   :  { %55 = vrot.lane.b32.xlu0 %v205_v8, %s267_s7  ;;  %61 = vrot.lane.b32.xlu1 %v206_v9, %s268_s8  ;;  %s277_s8 = smov 52   ;;  %vm81_vm13 = vcmask 654944   ;;  %vm87_vm14 = vcmask 622144   ;;  %vm93_vm15 = vcmask 589344   ;;  %vm99_vm0 = vcmask 556544  }
  0x16   :  { %67 = vrot.lane.b32.xlu0 %v207_v11, %s269_s13  ;;  %73 = vrot.lane.b32.xlu1 %v208_v12, %s270_s14  ;;  %s279_s14 = smov 44  }
  0x1a   :  { %79 = vrot.lane.b32.xlu0 %v209_v13, %s271_s19  ;;  %85 = vrot.lane.b32.xlu1 %v210_v14, %s272_s20  ;;  %s281_s20 = smov 36  }
  0x1e   :  { %91 = vrot.lane.b32.xlu0 %v211_v15, %s273_s25  ;;  %97 = vrot.lane.b32.xlu1 %v212_v16, %s274_s26  ;;  %s283_s26 = smov 28  }
  0x22   :  { %103 = vrot.lane.b32.xlu0 %v213_v17, %s275_s2  ;;  %109 = vrot.lane.b32.xlu1 %v214_v18, %s276_s3  ;;  %s285_s3 = smov 20  }
  0x26   :  { %115 = vrot.lane.b32.xlu0 %v215_v19, %s277_s8  ;;  %121 = vrot.lane.b32.xlu1 %v216_v20, %s278_s9  ;;  %s287_s9 = smov 12  }
  0x2a   :  { %127 = vrot.lane.b32.xlu0 %v217_v21, %s279_s14  ;;  %133 = vrot.lane.b32.xlu1 %v218_v22, %s280_s15 }
  0x2e   :  { %139 = vrot.lane.b32.xlu0 %v219_v23, %s281_s20  ;;  %145 = vrot.lane.b32.xlu1 %v220_v24, %s282_s21 }
  0x32   :  { %151 = vrot.lane.b32.xlu0 %v221_v25, %s283_s26  ;;  %157 = vrot.lane.b32.xlu1 %v222_v26, %s284_s27 }
  0x36   :  { %163 = vrot.lane.b32.xlu0 %v223_v27, %s285_s3  ;;  %169 = vrot.lane.b32.xlu1 %v224_v28, %s286_s4 }
  0x3a   :  { %175 = vrot.lane.b32.xlu0 %v225_v29, %s287_s9  ;;  %181 = vrot.lane.b32.xlu1 %v226_v30, %s288_s10 }
  0x3e   :  { %187 = vrot.lane.b32.xlu0 %v227_v31, %s289_s0 }
  0x74   :  { %v8_v32 = vpop.permute.xlu0 %7   ;;  %v20_v33 = vpop.permute.xlu1 %19  }
  0x75   :  { %10 = vst.msk [vmem:[#allocation0] sm:$0x1] %vm9_vm1, %v8_v32   ;;  %vm105_vm1 = vcmask 523744  }
  0x78   :  { %v14_v34 = vpop.permute.xlu0 %13   ;;  %v26_v35 = vpop.permute.xlu1 %25  }
  0x79   :  { %16 = vst.msk [vmem:[#allocation0] sm:$0x1] %vm15_vm2, %v14_v34   ;;  %vm111_vm2 = vcmask 490944  }
  0x7a   :  { %22 = vst.msk [vmem:[#allocation0] sm:$0x1] %vm21_vm3, %v20_v33   ;;  %vm117_vm3 = vcmask 458144  }
  0x7b   :  { %28 = vst.msk [vmem:[#allocation0] sm:$0x1] %vm27_vm4, %v26_v35   ;;  %vm123_vm4 = vcmask 425344  }
  0x7c   :  { %v32_v36 = vpop.permute.xlu0 %31   ;;  %v38_v37 = vpop.permute.xlu1 %37  }
  0x7d   :  { %34 = vst.msk [vmem:[#allocation0] sm:$0x1] %vm33_vm5, %v32_v36   ;;  %vm129_vm5 = vcmask 392544  }
  0x7e   :  { %40 = vst.msk [vmem:[#allocation0] sm:$0x1] %vm39_vm6, %v38_v37   ;;  %vm135_vm6 = vcmask 359744  }
  0x80   :  { %v44_v38 = vpop.permute.xlu0 %43   ;;  %v50_v39 = vpop.permute.xlu1 %49  }
  0x81   :  { %46 = vst.msk [vmem:[#allocation0] sm:$0x1] %vm45_vm7, %v44_v38   ;;  %vm141_vm7 = vcmask 326944  }
  0x82   :  { %52 = vst.msk [vmem:[#allocation0] sm:$0x1] %vm51_vm8, %v50_v39   ;;  %vm147_vm8 = vcmask 294144  }
  0x84   :  { %v56_v40 = vpop.permute.xlu0 %55   ;;  %v62_v41 = vpop.permute.xlu1 %61  }
  0x85   :  { %58 = vst.msk [vmem:[#allocation0] sm:$0x1] %vm57_vm9, %v56_v40   ;;  %vm153_vm9 = vcmask 261344  }
  0x86   :  { %64 = vst.msk [vmem:[#allocation0] sm:$0x1] %vm63_vm10, %v62_v41   ;;  %vm159_vm10 = vcmask 228544  }
  0x88   :  { %v68_v42 = vpop.permute.xlu0 %67   ;;  %v74_v43 = vpop.permute.xlu1 %73  }
  0x89   :  { %70 = vst.msk [vmem:[#allocation0] sm:$0x1] %vm69_vm11, %v68_v42   ;;  %vm165_vm11 = vcmask 195744  }
  0x8a   :  { %76 = vst.msk [vmem:[#allocation0] sm:$0x1] %vm75_vm12, %v74_v43   ;;  %vm171_vm12 = vcmask 162944  }
  0x8c   :  { %v80_v44 = vpop.permute.xlu0 %79   ;;  %v86_v45 = vpop.permute.xlu1 %85  }
  0x8d   :  { %82 = vst.msk [vmem:[#allocation0] sm:$0x1] %vm81_vm13, %v80_v44   ;;  %vm177_vm13 = vcmask 130144  }
  0x8e   :  { %88 = vst.msk [vmem:[#allocation0] sm:$0x1] %vm87_vm14, %v86_v45   ;;  %vm183_vm14 = vcmask 97344  }
  0x90   :  { %v92_v46 = vpop.permute.xlu0 %91   ;;  %v98_v47 = vpop.permute.xlu1 %97  }
  0x91   :  { %94 = vst.msk [vmem:[#allocation0] sm:$0x1] %vm93_vm15, %v92_v46   ;;  %vm189_vm15 = vcmask 64544  }
  0x92   :  { %100 = vst.msk [vmem:[#allocation0] sm:$0x1] %vm99_vm0, %v98_v47  }
  0x94   :  { %v104_v48 = vpop.permute.xlu0 %103   ;;  %v110_v49 = vpop.permute.xlu1 %109  }
  0x95   :  { %106 = vst.msk [vmem:[#allocation0] sm:$0x1] %vm105_vm1, %v104_v48  }
  0x96   :  { %112 = vst.msk [vmem:[#allocation0] sm:$0x1] %vm111_vm2, %v110_v49  }
  0x98   :  { %v116_v50 = vpop.permute.xlu0 %115   ;;  %v122_v51 = vpop.permute.xlu1 %121  }
  0x99   :  { %118 = vst.msk [vmem:[#allocation0] sm:$0x1] %vm117_vm3, %v116_v50  }
  0x9a   :  { %124 = vst.msk [vmem:[#allocation0] sm:$0x1] %vm123_vm4, %v122_v51  }
  0x9c   :  { %v128_v52 = vpop.permute.xlu0 %127   ;;  %v134_v53 = vpop.permute.xlu1 %133  }
  0x9d   :  { %130 = vst.msk [vmem:[#allocation0] sm:$0x1] %vm129_vm5, %v128_v52  }
  0x9e   :  { %136 = vst.msk [vmem:[#allocation0] sm:$0x1] %vm135_vm6, %v134_v53  }
  0xa0   :  { %v140_v54 = vpop.permute.xlu0 %139   ;;  %v146_v55 = vpop.permute.xlu1 %145  }
  0xa1   :  { %142 = vst.msk [vmem:[#allocation0] sm:$0x1] %vm141_vm7, %v140_v54  }
  0xa2   :  { %148 = vst.msk [vmem:[#allocation0] sm:$0x1] %vm147_vm8, %v146_v55  }
  0xa4   :  { %v152_v56 = vpop.permute.xlu0 %151   ;;  %v158_v57 = vpop.permute.xlu1 %157  }
  0xa5   :  { %154 = vst.msk [vmem:[#allocation0] sm:$0x1] %vm153_vm9, %v152_v56  }
  0xa6   :  { %160 = vst.msk [vmem:[#allocation0] sm:$0x1] %vm159_vm10, %v158_v57  }
  0xa8   :  { %v164_v58 = vpop.permute.xlu0 %163   ;;  %v170_v59 = vpop.permute.xlu1 %169  }
  0xa9   :  { %166 = vst.msk [vmem:[#allocation0] sm:$0x1] %vm165_vm11, %v164_v58  }
  0xaa   :  { %172 = vst.msk [vmem:[#allocation0] sm:$0x1] %vm171_vm12, %v170_v59  }
  0xac   :  { %v176_v60 = vpop.permute.xlu0 %175   ;;  %v182_v61 = vpop.permute.xlu1 %181  }
  0xad   :  { %178 = vst.msk [vmem:[#allocation0] sm:$0x1] %vm177_vm13, %v176_v60  }
  0xae   :  { %184 = vst.msk [vmem:[#allocation0] sm:$0x1] %vm183_vm14, %v182_v61  }
  0xb0   :  { %v188_v62 = vpop.permute.xlu0 %187  }
  0xb1   :  { %190 = vst.msk [vmem:[#allocation0] sm:$0x1] %vm189_vm15, %v188_v62  }
  0xb8   :  { %v194_v63 = vld [vmem:[#allocation0] sm:$0x1] }
  0xb9   :  { %196 = vst [vmem:[%s400_s1] sm:$0x1] %v194_v63 }

// kernel: resblock_pallas.1
= control target key start
LH: loop header
LB: loop body
LE: loop exit
PB: predicated region body
PF: predicated region fallthrough
CT: control target
= control target key end

     0   :  { %s1499_s24 = smov 0   ;;  %s1890_s0 = inlined_call_operand.vmem [shape: f32[2,8,128], index: 0, kind: input, shape index: {}]   ;;  %s1891_s1 = inlined_call_operand.vmem [shape: f32[3,128,128], index: 1, kind: input, shape index: {}]   ;;  %s1892_s2 = inlined_call_operand.vmem [shape: f32[1,128], index: 2, kind: input, shape index: {}]   ;;  %s1893_s3 = inlined_call_operand.vmem [shape: f32[1,128], index: 3, kind: input, shape index: {}]   ;;  %s1894_s4 = inlined_call_operand.vmem [shape: f32[3,128,128], index: 4, kind: input, shape index: {}]   ;;  %s1895_s5 = inlined_call_operand.vmem [shape: f32[1,128], index: 5, kind: input, shape index: {}]   ;;  %s1896_s6 = inlined_call_operand.vmem [shape: f32[1,128], index: 6, kind: input, shape index: {}]   ;;  %s1897_s7 = inlined_call_operand.vmem [shape: f32[2,8,128], index: 7, kind: output, shape index: {}]  }
   0x1 LB: > { %s896_s25 = sadd.s32 4294967295, %s1454_s24   ;;  %p900_p0 = scmp.ge.s32.totalorder %s1454_s24, 1  ;;  %s1454_s24 = sphi %s1499_s24, %s17_s24  }
   0x2   : > { %p236_p1 = scmp.lt.s32.totalorder %s1454_s24, 3 }
   0x4   : > { %p237_p2 = pnand %p900_p0, %p236_p1 }
   0x5   : > { %v903_v0 = vld [vmem:[%s1891_s1 + $0x80] sm:$0xff] (!%p237_p2)  ;;  %v904_v1 = vld [vmem:[%s1891_s1 + $0x88] sm:$0xff] (!%p237_p2)  ;;  %v905_v2 = vld [vmem:[%s1891_s1 + $0x90] sm:$0xff] (!%p237_p2)  ;;  %v1456_v3 = vmov (!%p237_p2), 0.0|0.0   ;;  %v1457_v6 = vmov (!%p237_p2), 0.0   ;;  %vm1458_vm0 = vmmov (!%p237_p2), 0  }
   0x6   : > { %240 = sbr.rel (%p237_p2) target bundleno = 606 (0x25e), region = 48  ;;  %1285 = vmatprep.subr.bf16.mxu0 (!%p237_p2), %v1456_v3  ;;  %v1286_v4 = vpack.c.bf16 (!%p237_p2), %v904_v1, %v903_v0  ;;  %v906_v5 = vld [vmem:[%s1891_s1 + $0x98] sm:$0xff] (!%p237_p2)  ;;  %275 = vst [vmem:[#allocation2] sm:$0x1] (!%p237_p2), %v1457_v6  ;;  %276 = vst [vmem:[#allocation2 + $0x9] sm:$0x1] (!%p237_p2), %v1457_v6  ;;  %1107 = vmatprep.mubr.msk.f32.mxu0 (!%p237_p2), %vm1458_vm0, %v1457_v6 }
   0x7   : > { %p266_p3 = scmp.lt.s32.totalorder (!%p237_p2), %s896_s25, 1  ;;  %1357 = vmatprep.subr.bf16.mxu1 (!%p237_p2), %v1456_v3  ;;  %1212 = vmatprep.mubr.msk.f32.mxu1 (!%p237_p2), %vm1458_vm0, %v1457_v6  ;;  %v1289_v7 = vpack.c.bf16 (!%p237_p2), %v906_v5, %v905_v2  ;;  %v907_v8 = vld [vmem:[%s1891_s1 + $0xa0] sm:$0xff] (!%p237_p2)  ;;  %v908_v9 = vld [vmem:[%s1891_s1 + $0xa8] sm:$0xff] (!%p237_p2)  ;;  %v909_v12 = vld [vmem:[%s1891_s1 + $0xb0] sm:$0xff] (!%p237_p2) }
   0x8   : > { %1287 = vmatpush3.bf16.msra.mxu0 (!%p237_p2), %v1286_v4  ;;  %v1292_v10 = vpack.c.bf16 (!%p237_p2), %v908_v9, %v907_v8  ;;  %v910_v13 = vld [vmem:[%s1891_s1 + $0xb8] sm:$0xff] (!%p237_p2)  ;;  %v911_v15 = vld [vmem:[%s1891_s1 + $0xc0] sm:$0xff] (!%p237_p2)  ;;  %v912_v16 = vld [vmem:[%s1891_s1 + $0xc8] sm:$0xff] (!%p237_p2) }
   0x9   : > { %1288 = vmatprep.subr.bf16.mxu0 (!%p237_p2), %v1456_v3  ;;  %v1295_v14 = vpack.c.bf16 (!%p237_p2), %v910_v13, %v909_v12  ;;  %v1298_v17 = vpack.c.bf16 (!%p237_p2), %v912_v16, %v911_v15  ;;  %v913_v18 = vld [vmem:[%s1891_s1 + $0xd0] sm:$0xff] (!%p237_p2)  ;;  %v914_v19 = vld [vmem:[%s1891_s1 + $0xd8] sm:$0xff] (!%p237_p2)  ;;  %v937_v20 = vld [vmem:[%s1894_s4 + $0x80] sm:$0xff] (!%p237_p2) }
   0xa   : > { %v938_v21 = vld [vmem:[%s1894_s4 + $0x88] sm:$0xff] (!%p237_p2)  ;;  %v939_v22 = vld [vmem:[%s1894_s4 + $0x90] sm:$0xff] (!%p237_p2)  ;;  %v940_v24 = vld [vmem:[%s1894_s4 + $0x98] sm:$0xff] (!%p237_p2)  ;;  %v1301_v25 = vpack.c.bf16 (!%p237_p2), %v914_v19, %v913_v18 }
   0xb   : > { %v1358_v23 = vpack.c.bf16 (!%p237_p2), %v938_v21, %v937_v20  ;;  %v915_v26 = vld [vmem:[%s1891_s1 + $0xe0] sm:$0xff] (!%p237_p2)  ;;  %v916_v27 = vld [vmem:[%s1891_s1 + $0xe8] sm:$0xff] (!%p237_p2)  ;;  %v1361_v28 = vpack.c.bf16 (!%p237_p2), %v940_v24, %v939_v22  ;;  %v917_v32 = vld [vmem:[%s1891_s1 + $0xf0] sm:$0xff] (!%p237_p2) }
   0xc   : > { %1290 = vmatpush3.bf16.msra.mxu0 (!%p237_p2), %v1289_v7  ;;  %v941_v29 = vld [vmem:[%s1894_s4 + $0xa0] sm:$0xff] (!%p237_p2)  ;;  %v942_v30 = vld [vmem:[%s1894_s4 + $0xa8] sm:$0xff] (!%p237_p2)  ;;  %v1304_v31 = vpack.c.bf16 (!%p237_p2), %v916_v27, %v915_v26  ;;  %v918_v33 = vld [vmem:[%s1891_s1 + $0xf8] sm:$0xff] (!%p237_p2) }
   0xd   : > { %s1899_s25 = smov (!%p266_p3, %s896_s25), 1  ;;  %1291 = vmatprep.subr.bf16.mxu0 %v1456_v3  ;;  %1359 = vmatpush3.bf16.msra.mxu1 %v1358_v23  ;;  %v1364_v34 = vpack.c.bf16 %v942_v30, %v941_v29  ;;  %v943_v35 = vld [vmem:[%s1894_s4 + $0xb0] sm:$0xff]  ;;  %v944_v36 = vld [vmem:[%s1894_s4 + $0xb8] sm:$0xff]  ;;  %v1307_v37 = vpack.c.bf16 %v918_v33, %v917_v32  ;;  %v279_v38 = vld [vmem:[%s1891_s1] sm:$0xff] }
   0xe   : > { %s901_s15 = sshll.u32 %s1899_s25, 3  ;;  %1360 = vmatprep.subr.bf16.mxu1 %v1456_v3  ;;  %v280_v39 = vld [vmem:[%s1891_s1 + $0x8] sm:$0xff]  ;;  %v1367_v40 = vpack.c.bf16 %v944_v36, %v943_v35  ;;  %v945_v41 = vld [vmem:[%s1894_s4 + $0xc0] sm:$0xff]  ;;  %v281_v44 = vld [vmem:[%s1891_s1 + $0x10] sm:$0xff] }
   0xf   : > { %s269_s18 = scalar_lea.vmem %s1890_s0, %s901_s15  ;;  %v946_v42 = vld [vmem:[%s1894_s4 + $0xc8] sm:$0xff]  ;;  %v1310_v43 = vpack.c.bf16 %v280_v39, %v279_v38  ;;  %v282_v45 = vld [vmem:[%s1891_s1 + $0x18] sm:$0xff]  ;;  %v283_v48 = vld [vmem:[%s1891_s1 + $0x20] sm:$0xff]  ;;  %s273_s8 = scalar_lea.vmem %s1897_s7, %s901_s15 }
  0x10   : > { %v1542_v11 = vld [vmem:[%s269_s18] sm:$0xff]  ;;  %1293 = vmatpush3.bf16.msra.mxu0 %v1292_v10  ;;  %v1370_v46 = vpack.c.bf16 %v946_v42, %v945_v41  ;;  %v1313_v47 = vpack.c.bf16 %v282_v45, %v281_v44  ;;  %v284_v49 = vld [vmem:[%s1891_s1 + $0x28] sm:$0xff]  ;;  %v285_v51 = vld [vmem:[%s1891_s1 + $0x30] sm:$0xff] }
  0x11   : > { %277 = vst [vmem:[#allocation2 + $0x1] sm:$0xff] %v1542_v11  ;;  %1294 = vmatprep.subr.bf16.mxu0 %v1456_v3  ;;  %1362 = vmatpush3.bf16.msra.mxu1 %v1361_v28  ;;  %v1316_v50 = vpack.c.bf16 %v284_v49, %v283_v48  ;;  %v286_v52 = vld [vmem:[%s1891_s1 + $0x38] sm:$0xff]  ;;  %v287_v54 = vld [vmem:[%s1891_s1 + $0x40] sm:$0xff]  ;;  %v288_v55 = vld [vmem:[%s1891_s1 + $0x48] sm:$0xff] }
  0x12   : > { %1363 = vmatprep.subr.bf16.mxu1 %v1456_v3  ;;  %v1319_v53 = vpack.c.bf16 %v286_v52, %v285_v51  ;;  %v1322_v56 = vpack.c.bf16 %v288_v55, %v287_v54  ;;  %v289_v57 = vld [vmem:[%s1891_s1 + $0x50] sm:$0xff]  ;;  %v290_v58 = vld [vmem:[%s1891_s1 + $0x58] sm:$0xff]  ;;  %v291_v60 = vld [vmem:[%s1891_s1 + $0x60] sm:$0xff] }
  0x13   : > { %v1325_v59 = vpack.c.bf16 %v290_v58, %v289_v57  ;;  %v292_v61 = vld [vmem:[%s1891_s1 + $0x68] sm:$0xff]  ;;  %v293_v63 = vld [vmem:[%s1891_s1 + $0x70] sm:$0xff]  ;;  %v294_v0 = vld [vmem:[%s1891_s1 + $0x78] sm:$0xff] }
  0x14   : > { %1296 = vmatpush3.bf16.msra.mxu0 %v1295_v14  ;;  %v1328_v62 = vpack.c.bf16 %v292_v61, %v291_v60  ;;  %v1331_v1 = vpack.c.bf16 %v294_v0, %v293_v63  ;;  %v919_v2 = vld [vmem:[%s1891_s1 + $0x100] sm:$0xff]  ;;  %v920_v4 = vld [vmem:[%s1891_s1 + $0x108] sm:$0xff]  ;;  %v921_v8 = vld [vmem:[%s1891_s1 + $0x110] sm:$0xff] }
  0x15   : > { %1297 = vmatprep.subr.bf16.mxu0 %v1456_v3  ;;  %1365 = vmatpush3.bf16.msra.mxu1 %v1364_v34  ;;  %v1334_v7 = vpack.c.bf16 %v920_v4, %v919_v2  ;;  %v922_v9 = vld [vmem:[%s1891_s1 + $0x118] sm:$0xff]  ;;  %v923_v12 = vld [vmem:[%s1891_s1 + $0x120] sm:$0xff]  ;;  %v924_v13 = vld [vmem:[%s1891_s1 + $0x128] sm:$0xff] }
  0x16   : > { %1366 = vmatprep.subr.bf16.mxu1 %v1456_v3  ;;  %v1337_v10 = vpack.c.bf16 %v922_v9, %v921_v8  ;;  %v1340_v14 = vpack.c.bf16 %v924_v13, %v923_v12  ;;  %v925_v15 = vld [vmem:[%s1891_s1 + $0x130] sm:$0xff]  ;;  %v926_v16 = vld [vmem:[%s1891_s1 + $0x138] sm:$0xff]  ;;  %v927_v18 = vld [vmem:[%s1891_s1 + $0x140] sm:$0xff] }
  0x17   : > { %v928_v19 = vld [vmem:[%s1891_s1 + $0x148] sm:$0xff]  ;;  %v929_v21 = vld [vmem:[%s1891_s1 + $0x150] sm:$0xff]  ;;  %v930_v22 = vld [vmem:[%s1891_s1 + $0x158] sm:$0xff] }
  0x18   : > { %1299 = vmatpush3.bf16.msra.mxu0 %v1298_v17  ;;  %v278_v5 = vld [vmem:[#allocation2] sm:$0xff]  ;;  %v1343_v17 = vpack.c.bf16 %v926_v16, %v925_v15  ;;  %v1346_v20 = vpack.c.bf16 %v928_v19, %v927_v18  ;;  %v1349_v23 = vpack.c.bf16 %v930_v22, %v929_v21  ;;  %v933_v27 = vld [vmem:[%s1891_s1 + $0x170] sm:$0xff]  ;;  %v934_v28 = vld [vmem:[%s1891_s1 + $0x178] sm:$0xff] }
  0x19   : > { %1300 = vmatprep.subr.bf16.mxu0 %v1456_v3  ;;  %1368 = vmatpush3.bf16.msra.mxu1 %v1367_v40  ;;  %v931_v24 = vld [vmem:[%s1891_s1 + $0x160] sm:$0xff]  ;;  %v1355_v29 = vpack.c.bf16 %v934_v28, %v933_v27  ;;  %v948_v32 = vld [vmem:[%s1894_s4 + $0xd8] sm:$0xff]  ;;  %v950_v35 = vld [vmem:[%s1894_s4 + $0xe8] sm:$0xff] }
  0x1a   : > { %1369 = vmatprep.subr.bf16.mxu1 %v1456_v3  ;;  %v453_v30 = vld [vmem:[#allocation2 + $0x2] sm:$0xff]  ;;  %v952_v38 = vld [vmem:[%s1894_s4 + $0xf8] sm:$0xff]  ;;  %v935_v40 = vld [vmem:[%s1892_s2] ss:$0 sm:$0xff] }
  0x1b   : > { %v949_v34 = vld [vmem:[%s1894_s4 + $0xe0] sm:$0xff]  ;;  %v564_v51 = vld [vmem:[%s1894_s4 + $0x18] sm:$0xff]  ;;  %v566_v54 = vld [vmem:[%s1894_s4 + $0x28] sm:$0xff] }
  0x1c   : > { %1302 = vmatpush3.bf16.msra.mxu0 %v1301_v25  ;;  %v932_v25 = vld [vmem:[%s1891_s1 + $0x168] sm:$0xff]  ;;  %v1376_v36 = vpack.c.bf16 %v950_v35, %v949_v34  ;;  %v936_v42 = vld [vmem:[%s1893_s3] ss:$0 sm:$0xff]  ;;  %v568_v57 = vld [vmem:[%s1894_s4 + $0x38] sm:$0xff] }
  0x1d   : > { %1303 = vmatprep.subr.bf16.mxu0 %v1456_v3  ;;  %1371 = vmatpush3.bf16.msra.mxu1 %v1370_v46  ;;  %v1352_v26 = vpack.c.bf16 %v932_v25, %v931_v24  ;;  %v561_v45 = vld [vmem:[%s1894_s4] sm:$0xff]  ;;  %v562_v46 = vld [vmem:[%s1894_s4 + $0x8] sm:$0xff]  ;;  %v572_v63 = vld [vmem:[%s1894_s4 + $0x58] sm:$0xff] }
  0x1e   : > { %1372 = vmatprep.subr.bf16.mxu1 %v1456_v3  ;;  %v1382_v48 = vpack.c.bf16 %v562_v46, %v561_v45  ;;  %v570_v60 = vld [vmem:[%s1894_s4 + $0x48] sm:$0xff]  ;;  %v953_v9 = vld [vmem:[%s1894_s4 + $0x100] sm:$0xff]  ;;  %v955_v13 = vld [vmem:[%s1894_s4 + $0x110] sm:$0xff] }
  0x1f   : > { %v574_v2 = vld [vmem:[%s1894_s4 + $0x68] sm:$0xff]  ;;  %v961_v22 = vld [vmem:[%s1894_s4 + $0x140] sm:$0xff]  ;;  %v963_v25 = vld [vmem:[%s1894_s4 + $0x150] sm:$0xff] }
  0x20   : > { %1305 = vmatpush3.bf16.msra.mxu0 %v1304_v31  ;;  %v947_v31 = vld [vmem:[%s1894_s4 + $0xd0] sm:$0xff]  ;;  %v958_v18 = vld [vmem:[%s1894_s4 + $0x128] sm:$0xff]  ;;  %v965_v28 = vld [vmem:[%s1894_s4 + $0x160] sm:$0xff] }
  0x21   : > { %1306 = vmatprep.subr.bf16.mxu0 %v1456_v3  ;;  %v1373_v33 = vpack.c.bf16 %v948_v32, %v947_v31  ;;  %v967_v31 = vld [vmem:[%s1894_s4 + $0x170] sm:$0xff]  ;;  %v968_v32 = vld [vmem:[%s1894_s4 + $0x178] sm:$0xff]  ;;  %v969_v35 = vld [vmem:[%s1895_s5] ss:$0 sm:$0xff] }
  0x23   : > { %1374 = vmatpush3.bf16.msra.mxu1 %v1373_v33  ;;  %v1427_v33 = vpack.c.bf16 %v968_v32, %v967_v31 }
  0x24   : > { %1308 = vmatpush3.bf16.msra.mxu0 %v1307_v37  ;;  %1375 = vmatprep.subr.bf16.mxu1 %v1456_v3  ;;  %v951_v37 = vld [vmem:[%s1894_s4 + $0xf0] sm:$0xff] }
  0x25   : > { %1309 = vmatprep.subr.bf16.mxu0 %v1456_v3  ;;  %v1379_v39 = vpack.c.bf16 %v952_v38, %v951_v37  ;;  %v970_v37 = vld [vmem:[%s1896_s6] ss:$0 sm:$0xff] }
  0x27   : > { %1108 = vmatmul.mubr.f32.vlgmr.msra.gmra.mrb[0].mxu0 %v1542_v11  ;;  %1377 = vmatpush3.bf16.msra.mxu1 %v1376_v36 }
  0x28   : > { %1311 = vmatpush3.bf16.msra.mxu0 %v1310_v43  ;;  %1142 = vmatprep.mubr.msk.f32.mxu0 %vm1458_vm0, %v1457_v6 }
  0x29   : > { %1312 = vmatprep.subr.bf16.mxu0 %v1456_v3  ;;  %1378 = vmatprep.subr.bf16.mxu1 %v1456_v3 }
  0x2b   : > { %1380 = vmatpush3.bf16.msra.mxu1 %v1379_v39 }
  0x2c   : > { %1314 = vmatpush3.bf16.msra.mxu0 %v1313_v47  ;;  %1381 = vmatprep.subr.bf16.mxu1 %v1456_v3 }
  0x2d   : > { %1315 = vmatprep.subr.bf16.mxu0 %v1456_v3 }
  0x30   : > { %1317 = vmatpush3.bf16.msra.mxu0 %v1316_v50  ;;  %v563_v50 = vld [vmem:[%s1894_s4 + $0x10] sm:$0xff] }
  0x31   : > { %1318 = vmatprep.subr.bf16.mxu0 %v1456_v3  ;;  %v1385_v52 = vpack.c.bf16 %v564_v51, %v563_v50 }
  0x34   : > { %1320 = vmatpush3.bf16.msra.mxu0 %v1319_v53  ;;  %v565_v53 = vld [vmem:[%s1894_s4 + $0x20] sm:$0xff] }
  0x35   : > { %1321 = vmatprep.subr.bf16.mxu0 %v1456_v3  ;;  %v1388_v55 = vpack.c.bf16 %v566_v54, %v565_v53 }
  0x38   : > { %1323 = vmatpush3.bf16.msra.mxu0 %v1322_v56  ;;  %v567_v56 = vld [vmem:[%s1894_s4 + $0x30] sm:$0xff] }
  0x39   : > { %1324 = vmatprep.subr.bf16.mxu0 %v1456_v3  ;;  %v1391_v58 = vpack.c.bf16 %v568_v57, %v567_v56 }
  0x3c   : > { %1326 = vmatpush3.bf16.msra.mxu0 %v1325_v59  ;;  %v569_v59 = vld [vmem:[%s1894_s4 + $0x40] sm:$0xff] }
  0x3d   : > { %1327 = vmatprep.subr.bf16.mxu0 %v1456_v3  ;;  %v1394_v61 = vpack.c.bf16 %v570_v60, %v569_v59 }
  0x40   : > { %1329 = vmatpush3.bf16.msra.mxu0 %v1328_v62  ;;  %v571_v62 = vld [vmem:[%s1894_s4 + $0x50] sm:$0xff] }
  0x41   : > { %1330 = vmatprep.subr.bf16.mxu0 %v1456_v3  ;;  %v1397_v0 = vpack.c.bf16 %v572_v63, %v571_v62 }
  0x44   : > { %1332 = vmatpush3.bf16.msra.mxu0 %v1331_v1  ;;  %v573_v1 = vld [vmem:[%s1894_s4 + $0x60] sm:$0xff] }
  0x45   : > { %1333 = vmatprep.subr.bf16.mxu0 %v1456_v3  ;;  %v1400_v4 = vpack.c.bf16 %v574_v2, %v573_v1 }
  0x47   : > { %1143 = vmatmul.mubr.f32.vlgmr.msra.gmra.mrb[0].mxu0 %v278_v5  ;;  %v575_v5 = vld [vmem:[%s1894_s4 + $0x70] sm:$0xff] }
  0x48   : > { %1335 = vmatpush3.bf16.msra.mxu0 %v1334_v7  ;;  %1177 = vmatprep.mubr.msk.f32.mxu0 %vm1458_vm0, %v1457_v6  ;;  %v576_v7 = vld [vmem:[%s1894_s4 + $0x78] sm:$0xff] }
  0x49   : > { %1336 = vmatprep.subr.bf16.mxu0 %v1456_v3  ;;  %v1403_v8 = vpack.c.bf16 %v576_v7, %v575_v5 }
  0x4c   : > { %1338 = vmatpush3.bf16.msra.mxu0 %v1337_v10  ;;  %v954_v10 = vld [vmem:[%s1894_s4 + $0x108] sm:$0xff] }
  0x4d   : > { %1339 = vmatprep.subr.bf16.mxu0 %v1456_v3  ;;  %v1406_v12 = vpack.c.bf16 %v954_v10, %v953_v9 }
  0x50   : > { %1341 = vmatpush3.bf16.msra.mxu0 %v1340_v14  ;;  %v956_v14 = vld [vmem:[%s1894_s4 + $0x118] sm:$0xff] }
  0x51   : > { %1342 = vmatprep.subr.bf16.mxu0 %v1456_v3  ;;  %v1409_v16 = vpack.c.bf16 %v956_v14, %v955_v13 }
  0x54   : > { %1344 = vmatpush3.bf16.msra.mxu0 %v1343_v17  ;;  %v957_v17 = vld [vmem:[%s1894_s4 + $0x120] sm:$0xff] }
  0x55   : > { %1345 = vmatprep.subr.bf16.mxu0 %v1456_v3  ;;  %v1412_v19 = vpack.c.bf16 %v958_v18, %v957_v17 }
  0x58   : > { %1347 = vmatpush3.bf16.msra.mxu0 %v1346_v20  ;;  %v959_v20 = vld [vmem:[%s1894_s4 + $0x130] sm:$0xff] }
  0x59   : > { %1348 = vmatprep.subr.bf16.mxu0 %v1456_v3 }
  0x5c   : > { %1350 = vmatpush3.bf16.msra.mxu0 %v1349_v23  ;;  %v962_v23 = vld [vmem:[%s1894_s4 + $0x148] sm:$0xff] }
  0x5d   : > { %1351 = vmatprep.subr.bf16.mxu0 %v1456_v3  ;;  %v1418_v24 = vpack.c.bf16 %v962_v23, %v961_v22 }
  0x60   : > { %1353 = vmatpush3.bf16.msra.mxu0 %v1352_v26  ;;  %v964_v26 = vld [vmem:[%s1894_s4 + $0x158] sm:$0xff] }
  0x61   : > { %1354 = vmatprep.subr.bf16.mxu0 %v1456_v3  ;;  %v1421_v27 = vpack.c.bf16 %v964_v26, %v963_v25 }
  0x64   : > { %1356 = vmatpush3.bf16.msra.mxu0 %v1355_v29  ;;  %v966_v29 = vld [vmem:[%s1894_s4 + $0x168] sm:$0xff] }
  0x67   : > { %1178 = vmatmul.mubr.f32.vlgmr.msra.gmra.mrb[0].mxu0 %v453_v30  ;;  %v1424_v30 = vpack.c.bf16 %v966_v29, %v965_v28 }
 0x13a   : > { %v537_v41 = vpop.f32.mrb[0].mxu0 }
 0x13b   : > { %v549_v43 = vmul.f32 %v935_v40, %v537_v41  ;;  %v1179_v44 = vpop.f32.mrb[1].mxu0 }
 0x13d   : > { %v557_v47 = vadd.f32 %v936_v42, %v549_v43 }
 0x13f   : > { %v558_v49 = vmax.f32 %v557_v47, 0.0 }
 0x141   : > { %559 = vst [vmem:[#allocation2 + $0x1] sm:$0xff] %v558_v49  ;;  %1213 = vmatmul.mubr.f32.vlgmr.msra.gmra.mrb[0].mxu1 %v558_v49 }
 0x142   : > { %1383 = vmatpush3.bf16.msra.mxu1 %v1382_v48  ;;  %1247 = vmatprep.mubr.msk.f32.mxu1 %vm1458_vm0, %v1457_v6 }
 0x143   : > { %1384 = vmatprep.subr.bf16.mxu1 %v1456_v3 }
 0x146   : > { %1386 = vmatpush3.bf16.msra.mxu1 %v1385_v52 }
 0x147   : > { %1387 = vmatprep.subr.bf16.mxu1 %v1456_v3 }
 0x148   : > { %v560_v15 = vld [vmem:[#allocation2] sm:$0xff] }
 0x149   : > { %v735_v34 = vld [vmem:[#allocation2 + $0x2] sm:$0xff] }
 0x14a   : > { %1389 = vmatpush3.bf16.msra.mxu1 %v1388_v55 }
 0x14b   : > { %1390 = vmatprep.subr.bf16.mxu1 %v1456_v3 }
 0x14e   : > { %1392 = vmatpush3.bf16.msra.mxu1 %v1391_v58 }
 0x14f   : > { %1393 = vmatprep.subr.bf16.mxu1 %v1456_v3 }
 0x152   : > { %1395 = vmatpush3.bf16.msra.mxu1 %v1394_v61 }
 0x153   : > { %1396 = vmatprep.subr.bf16.mxu1 %v1456_v3 }
 0x156   : > { %1398 = vmatpush3.bf16.msra.mxu1 %v1397_v0 }
 0x157   : > { %1399 = vmatprep.subr.bf16.mxu1 %v1456_v3 }
 0x15a   : > { %1401 = vmatpush3.bf16.msra.mxu1 %v1400_v4 }
 0x15b   : > { %1402 = vmatprep.subr.bf16.mxu1 %v1456_v3 }
 0x15e   : > { %1404 = vmatpush3.bf16.msra.mxu1 %v1403_v8 }
 0x15f   : > { %1405 = vmatprep.subr.bf16.mxu1 %v1456_v3 }
 0x161   : > { %1248 = vmatmul.mubr.f32.vlgmr.msra.gmra.mrb[0].mxu1 %v560_v15 }
 0x162   : > { %1407 = vmatpush3.bf16.msra.mxu1 %v1406_v12  ;;  %1282 = vmatprep.mubr.msk.f32.mxu1 %vm1458_vm0, %v1457_v6  ;;  %v960_v6 = vld [vmem:[%s1894_s4 + $0x138] sm:$0xff] }
 0x163   : > { %1408 = vmatprep.subr.bf16.mxu1 %v1456_v3  ;;  %v1415_v21 = vpack.c.bf16 %v960_v6, %v959_v20 }
 0x166   : > { %1410 = vmatpush3.bf16.msra.mxu1 %v1409_v16 }
 0x167   : > { %1411 = vmatprep.subr.bf16.mxu1 %v1456_v3 }
 0x16a   : > { %1413 = vmatpush3.bf16.msra.mxu1 %v1412_v19 }
 0x16b   : > { %1414 = vmatprep.subr.bf16.mxu1 %v1456_v3 }
 0x16e   : > { %1416 = vmatpush3.bf16.msra.mxu1 %v1415_v21 }
 0x16f   : > { %1417 = vmatprep.subr.bf16.mxu1 %v1456_v3 }
 0x172   : > { %1419 = vmatpush3.bf16.msra.mxu1 %v1418_v24 }
 0x173   : > { %1420 = vmatprep.subr.bf16.mxu1 %v1456_v3 }
 0x176   : > { %1422 = vmatpush3.bf16.msra.mxu1 %v1421_v27 }
 0x177   : > { %1423 = vmatprep.subr.bf16.mxu1 %v1456_v3 }
 0x17a   : > { %1425 = vmatpush3.bf16.msra.mxu1 %v1424_v30 }
 0x17b   : > { %1426 = vmatprep.subr.bf16.mxu1 %v1456_v3 }
 0x17e   : > { %1428 = vmatpush3.bf16.msra.mxu1 %v1427_v33 }
 0x181   : > { %1283 = vmatmul.mubr.f32.vlgmr.msra.gmra.mrb[0].mxu1 %v735_v34 }
 0x254   : > { %v819_v36 = vpop.f32.mrb[0].mxu1 }
 0x255   : > { %v831_v38 = vmul.f32 %v969_v35, %v819_v36  ;;  %v1284_v39 = vpop.f32.mrb[1].mxu1 }
 0x257   : > { %v839_v40 = vadd.f32 %v970_v37, %v831_v38 }
 0x259   : > { %v840_v41 = vadd.f32 %v839_v40, %v1542_v11 }
 0x25b   : > { %v841_v3 = vmax.f32 %v840_v41, 0.0 }
 0x25d   : > { %842 = vst [vmem:[%s273_s8] sm:$0xff] %v841_v3 }
 0x25e PF: > { %s17_s24 = sadd.s32 1, %s1454_s24  }
 0x25f   : > { %p14_p4 = scmp.ge.s32.totalorder %s17_s24, 4  }
 0x261   :  { %16 = sbr.rel (!%p14_p4) target bundleno = 1 (0x1), region = 82 }

</bundles_post_ra>
